<compile_context>
chip_gen: v7x
topology: tpu7x:2x2x1
jax: 0.10.0
libtpu: 0.0.40
codegen_flags: <defaults>
</compile_context>

<pallas_src>
import functools

import jax
import jax.numpy as jnp
from jax.experimental import pallas as pl
from jax.experimental.pallas import tpu as pltpu


def _round_up(a, b):
    return (a + b - 1) // b * b


def _padded_row_bytes(T, V, T_out, W, dtype):
    """Per-(n,c)-row VMEM footprint of one input + one output block, (8,128)-padded."""
    itemsize = jnp.dtype(dtype).itemsize
    return (
        _round_up(T, 8) * _round_up(V, 128)
        + _round_up(T_out, 8) * _round_up(W * V, 128)
    ) * itemsize


def _choose_row_tile(NC, per_row_bytes, budget_bytes=12 * 1024 * 1024):
    """Largest divisor of NC whose double-buffered blocks fit the VMEM budget."""
    max_rows = max(1, budget_bytes // (2 * per_row_bytes))  # x2: double buffering
    divisors = [d for d in range(1, NC + 1) if NC % d == 0]
    fitting = [d for d in divisors if d <= max_rows]
    r = max(fitting) if fitting else 1
    # Keep >= 2 grid steps when each step is big enough to amortize the ~0.35us
    # per-step overhead, so megacore (v7x) can shard the parallel axis and the
    # inbound/outbound DMAs of successive steps overlap.
    if NC // r < 2 and r * per_row_bytes > (1 << 20):
        split = [d for d in fitting if NC // d >= 2]
        if split:
            r = max(split)
    return r


def _make_unfold_kernel(T, V, T_out, W, stride, dilation, padding, dtype):
    """Kernel over a block of R independent (n, c) rows."""

    def kernel(x_ref, o_ref):
        # x_ref: (R, T, V)    o_ref: (R, T_out, W*V)
        R = o_ref.shape[0]
        for w in range(W):                        # W is small & static -> unrolled
            offset = w * dilation - padding       # static Python int, may be negative
            lane_lo, lane_hi = w * V, (w + 1) * V
            # valid output times: 0 <= t*stride + offset <= T-1
            t_lo = 0 if offset >= 0 else (-offset + stride - 1) // stride
            t_hi = min((T - 1 - offset) // stride, T_out - 1)
            n_valid = t_hi - t_lo + 1

            if n_valid <= 0:
                # whole tap falls inside the zero padding
                o_ref[:, :, lane_lo:lane_hi] = jnp.zeros((R, T_out, V), dtype)
                continue

            src_start = t_lo * stride + offset
            if stride == 1:
                data = x_ref[:, src_start:src_start + n_valid, :]
            else:
                # strided temporal read straight from the ref (only needed rows)
                data = x_ref[:, pl.ds(src_start, n_valid, stride), :]

            # direct per-tap store of the valid rows into this tap's lane slab
            o_ref[:, t_lo:t_lo + n_valid, lane_lo:lane_hi] = data

            # zero-fill only the padded border rows of this tap
            if t_lo > 0:
                o_ref[:, 0:t_lo, lane_lo:lane_hi] = jnp.zeros((R, t_lo, V), dtype)
            if t_hi < T_out - 1:
                o_ref[:, t_hi + 1:T_out, lane_lo:lane_hi] = jnp.zeros(
                    (R, T_out - 1 - t_hi, V), dtype)

    return kernel


@functools.partial(
    jax.jit, static_argnames=("window_size", "window_stride", "window_dilation"))
def unfold_temporal_windows(x, window_size, window_stride=1, window_dilation=1):
    N, C, T, V = x.shape
    W, stride, dilation = window_size, window_stride, window_dilation
    padding = (W + (W - 1) * (dilation - 1) - 1) // 2
    T_out = (T + 2 * padding - dilation * (W - 1) - 1) // stride + 1

    NC = N * C
    x2 = x.reshape(NC, T, V)  # free: contiguous view, folds batch + channel tiling

    per_row = _padded_row_bytes(T, V, T_out, W, x.dtype)
    R = _choose_row_tile(NC, per_row)

    # Scoped-VMEM request derived from the real (double-buffered) block footprint,
    # with headroom; clamped to stay within v7x physical VMEM (64 MiB).
    vmem_bytes = int(min(max(32 << 20, 2 * R * per_row + (2 << 20)), 64 << 20))

    kernel = _make_unfold_kernel(T, V, T_out, W, stride, dilation, padding, x.dtype)

    out = pl.pallas_call(
        kernel,
        out_shape=jax.ShapeDtypeStruct((NC, T_out, W * V), x.dtype),
        grid=(NC // R,),
        in_specs=[pl.BlockSpec((R, T, V), lambda i: (i, 0, 0))],
        out_specs=pl.BlockSpec((R, T_out, W * V), lambda i: (i, 0, 0)),
        compiler_params=pltpu.CompilerParams(
            dimension_semantics=("parallel",),
            vmem_limit_bytes=vmem_bytes,
        ),
    )(x2)
    return out.reshape(N, C, T_out, W * V)


def _reference(x, window_size, window_stride=1, window_dilation=1):
    """Pure-JAX reference reproducing the torch Unfold + permute + view."""
    N, C, T, V = x.shape
    padding = (window_size + (window_size - 1) * (window_dilation - 1) - 1) // 2
    T_out = (T + 2 * padding - window_dilation * (window_size - 1) - 1) // window_stride + 1
    xp = jnp.pad(x, ((0, 0), (0, 0), (padding, padding), (0, 0)))
    cols = []
    for w in range(window_size):
        start = w * window_dilation
        stop = start + (T_out - 1) * window_stride + 1
        cols.append(xp[:, :, start:stop:window_stride, :])
    return jnp.concatenate(cols, axis=-1)


if __name__ == "__main__":
    key = jax.random.PRNGKey(0)
    # (N, C, T, V) — small shapes consistent with the module's forward
    x = jax.random.normal(key, (2, 4, 16, 16), dtype=jnp.float32)

    # Default module config plus stride>1 and dilation>1 paths.
    for (W, s, d) in [(3, 1, 1), (3, 2, 1), (3, 1, 2)]:
        out = unfold_temporal_windows(
            x, window_size=W, window_stride=s, window_dilation=d)
        out = jax.block_until_ready(out)
        ref = _reference(x, W, s, d)
        assert out.shape == ref.shape, (out.shape, ref.shape)
        assert out.dtype == x.dtype
        assert bool(jnp.array_equal(out, ref)), f"mismatch for W={W}, s={s}, d={d}"

    print("KERNEL_OK")
</pallas_src>

<mosaic_0001>
module attributes {stable_mosaic.version = 11 : i64} {
  func.func @kernel(%arg0: i32, %arg1: memref<8x16x16xf32, #tpu.memory_space<vmem>>, %arg2: memref<8x16x48xf32, #tpu.memory_space<vmem>>) attributes {dimension_semantics = [#tpu.dimension_semantics<parallel>], iteration_bounds = array<i64: 1>, scalar_prefetch = 0 : i64, scratch_operands = 0 : i64, tpu.core_type = #tpu.core_type<tc>, window_params = [{transform_indices = @transform_0, window_bounds = array<i64: 8, 16, 16>}, {transform_indices = @transform_1, window_bounds = array<i64: 8, 16, 48>}]} {
    %c0 = arith.constant 0 : index
    %c0_0 = arith.constant 0 : index
    %c0_1 = arith.constant 0 : index
    %0 = vector.load %arg1[%c0, %c0_0, %c0_1] : memref<8x16x16xf32, #tpu.memory_space<vmem>>, vector<8x15x16xf32>
    %c0_2 = arith.constant 0 : index
    %c1 = arith.constant 1 : index
    %c0_3 = arith.constant 0 : index
    %1 = vector.load %arg2[%c0_2, %c1, %c0_3] : memref<8x16x48xf32, #tpu.memory_space<vmem>>, vector<8x15x16xf32>
    tpu.vector_store %arg2[%c0_2, %c1, %c0_3], %0 {strides = array<i32>} : memref<8x16x48xf32, #tpu.memory_space<vmem>>, vector<8x15x16xf32>,
    %cst = arith.constant 0.000000e+00 : f32
    %2 = vector.broadcast %cst : f32 to vector<8x1x16xf32>
    %c0_4 = arith.constant 0 : index
    %c0_5 = arith.constant 0 : index
    %c0_6 = arith.constant 0 : index
    %3 = vector.load %arg2[%c0_4, %c0_5, %c0_6] : memref<8x16x48xf32, #tpu.memory_space<vmem>>, vector<8x1x16xf32>
    tpu.vector_store %arg2[%c0_4, %c0_5, %c0_6], %2 {strides = array<i32>} : memref<8x16x48xf32, #tpu.memory_space<vmem>>, vector<8x1x16xf32>,
    %c0_7 = arith.constant 0 : index
    %c0_8 = arith.constant 0 : index
    %c0_9 = arith.constant 0 : index
    %4 = vector.load %arg1[%c0_7, %c0_8, %c0_9] : memref<8x16x16xf32, #tpu.memory_space<vmem>>, vector<8x16x16xf32>
    %c0_10 = arith.constant 0 : index
    %c0_11 = arith.constant 0 : index
    %c16 = arith.constant 16 : index
    %5 = vector.load %arg2[%c0_10, %c0_11, %c16] : memref<8x16x48xf32, #tpu.memory_space<vmem>>, vector<8x16x16xf32>
    tpu.vector_store %arg2[%c0_10, %c0_11, %c16], %4 {strides = array<i32>} : memref<8x16x48xf32, #tpu.memory_space<vmem>>, vector<8x16x16xf32>,
    %c0_12 = arith.constant 0 : index
    %c1_13 = arith.constant 1 : index
    %c0_14 = arith.constant 0 : index
    %6 = vector.load %arg1[%c0_12, %c1_13, %c0_14] : memref<8x16x16xf32, #tpu.memory_space<vmem>>, vector<8x15x16xf32>
    %c0_15 = arith.constant 0 : index
    %c0_16 = arith.constant 0 : index
    %c32 = arith.constant 32 : index
    %7 = vector.load %arg2[%c0_15, %c0_16, %c32] : memref<8x16x48xf32, #tpu.memory_space<vmem>>, vector<8x15x16xf32>
    tpu.vector_store %arg2[%c0_15, %c0_16, %c32], %6 {strides = array<i32>} : memref<8x16x48xf32, #tpu.memory_space<vmem>>, vector<8x15x16xf32>,
    %cst_17 = arith.constant 0.000000e+00 : f32
    %8 = vector.broadcast %cst_17 : f32 to vector<8x1x16xf32>
    %c0_18 = arith.constant 0 : index
    %c15 = arith.constant 15 : index
    %c32_19 = arith.constant 32 : index
    %9 = vector.load %arg2[%c0_18, %c15, %c32_19] : memref<8x16x48xf32, #tpu.memory_space<vmem>>, vector<8x1x16xf32>
    tpu.vector_store %arg2[%c0_18, %c15, %c32_19], %8 {strides = array<i32>} : memref<8x16x48xf32, #tpu.memory_space<vmem>>, vector<8x1x16xf32>,
    return
  }
  func.func @transform_0(%arg0: i32) -> (i32, i32, i32) {
    %c0_i32 = arith.constant 0 : i32
    %c0_i32_0 = arith.constant 0 : i32
    %c0_i32_1 = arith.constant 0 : i32
    return %arg0, %c0_i32, %c0_i32_0 : i32, i32, i32
  }
  func.func @transform_1(%arg0: i32) -> (i32, i32, i32) {
    %c0_i32 = arith.constant 0 : i32
    %c0_i32_0 = arith.constant 0 : i32
    %c0_i32_1 = arith.constant 0 : i32
    return %arg0, %c0_i32, %c0_i32_0 : i32, i32, i32
  }
}

</mosaic_0001>

<bundles_post_ra>
// kernel: unfold_temporal_windows.1
= control target key start
LH: loop header
LB: loop body
LE: loop exit
PB: predicated region body
PF: predicated region fallthrough
CT: control target
= control target key end

     0   :  { %6 = vsyncpa [#allocation3], 0  ;;  %s477_s0 = inlined_call_operand.hbm [shape: f32[8,16,16], index: 0, kind: input, shape index: {}]   ;;  %s478_s1 = inlined_call_operand.hbm [shape: f32[8,16,48], index: 1, kind: output, shape index: {}]  }
   0x1   :  { %7 = vsyncpa [#allocation4], 0  ;;  %s342_s6 = smov [#allocation2]   ;;  %s294_s10 = scalar_lea.hbm %s477_s0, 2048 }
   0x2   :  { %s13_s7 = sshll.u32 %s342_s6, 4  ;;  %p295_p0 = scmp.ne.s32.totalorder %s477_s0, %s294_s10  ;;  %s14_s7 = int_to_ptr.vmem [resolvable:$true] %s13_s7 }
   0x3   :  { %p298_p1 = scmp.lt.u32.totalorder %s294_s10, %s477_s0 }
   0x5   :  { %p300_p2 = pnand %p298_p1, %p295_p0 }
   0x7   :  { %303 = shalt.err (!%p300_p2)
}
   0x8   :  { %s304_s15 = scalar_lea.vmem %s14_s7, 2048  ;;  %p309_p4 = scmp.lt.s32.totalorder %s14_s7, %s14_s7 }
   0x9   :  { %p305_p3 = scmp.ne.s32.totalorder %s14_s7, %s304_s15  ;;  %p310_p5 = scmp.lt.s32.totalorder %s304_s15, %s304_s15 }
   0xb   :  { %p311_p6 = por %p310_p5, %p309_p4 }
   0xd   :  { %p312_p7 = pnand %p311_p6, %p305_p3 }
   0xf   :  { %315 = shalt.err (!%p312_p7)
}
  0x10   :  { %s343_s16 = smov 128   ;;  %s344_s17 = smov 8  }
  0x11   :  { %19 = dma.hbm_to_vmem [thread:$0]  %s477_s0, 2048, %s14_s7, [#allocation3], %s343_s16, %s343_s16, %s344_s17  }
  0x12   :  { %338 = dma.done.wait [#allocation3], 2048  }
  0x13   :  { %339 = vsyncadd [#allocation3], 4294965248  ;;  %vm57_vm0 = vcmask 122880   ;;  %v345_v0 = vmov 0.0   ;;  %vm39_vm1 = vcmask 130048   ;;  %v68_v1 = vld [vmem:[#allocation2 + $0x10] sm:$0xff] }
  0x14   :  { %59 = vst.msk [vmem:[#allocation5 + $0x10] sm:$0x1] %vm57_vm0, %v345_v0  ;;  %58 = vst.msk [vmem:[#allocation5] sm:$0x1] %vm57_vm0, %v345_v0  ;;  %v66_v2 = vld [vmem:[#allocation2] sm:$0xff]  ;;  %s346_s0 = smov 16  }
  0x15   :  { %60 = vst.msk [vmem:[#allocation5 + $0x20] sm:$0x1] %vm57_vm0, %v345_v0  ;;  %61 = vst.msk [vmem:[#allocation5 + $0x30] sm:$0x1] %vm57_vm0, %v345_v0  ;;  %102 = vrot.lane.b32.xlu1 %v68_v1, %s346_s0  ;;  %98 = vrot.lane.b32.xlu0 %v66_v2, %s346_s0  ;;  %v70_v3 = vld [vmem:[#allocation2 + $0x20] sm:$0xff]  ;;  %v69_v4 = vld [vmem:[#allocation2 + $0x18] sm:$0xff] }
  0x16   :  { %62 = vst.msk [vmem:[#allocation5 + $0x40] sm:$0x1] %vm57_vm0, %v345_v0  ;;  %63 = vst.msk [vmem:[#allocation5 + $0x50] sm:$0x1] %vm57_vm0, %v345_v0  ;;  %v67_v5 = vld [vmem:[#allocation2 + $0x8] sm:$0xff]  ;;  %v72_v6 = vld [vmem:[#allocation2 + $0x30] sm:$0xff] }
  0x17   :  { %64 = vst.msk [vmem:[#allocation5 + $0x60] sm:$0x1] %vm57_vm0, %v345_v0  ;;  %65 = vst.msk [vmem:[#allocation5 + $0x70] sm:$0x1] %vm57_vm0, %v345_v0  ;;  %v74_v7 = vld [vmem:[#allocation2 + $0x40] sm:$0xff]  ;;  %v76_v8 = vld [vmem:[#allocation2 + $0x50] sm:$0xff] }
  0x18   :  { %43 = vst.msk [vmem:[#allocation5 + $0x11] sm:$0xff] %vm39_vm1, %v68_v1  ;;  %40 = vst.msk [vmem:[#allocation5 + $0x1] sm:$0xff] %vm39_vm1, %v66_v2  ;;  %v78_v9 = vld [vmem:[#allocation2 + $0x60] sm:$0xff]  ;;  %v80_v10 = vld [vmem:[#allocation2 + $0x70] sm:$0xff]  ;;  %vm41_vm2 = vcmask 129024   ;;  %s347_s20 = smov 32  }
  0x19   :  { %45 = vst.msk [vmem:[#allocation5 + $0x21] sm:$0xff] %vm39_vm1, %v70_v3  ;;  %47 = vst.msk [vmem:[#allocation5 + $0x31] sm:$0xff] %vm39_vm1, %v72_v6  ;;  %104 = vrot.lane.b32.xlu1 %v69_v4, %s346_s0  ;;  %100 = vrot.lane.b32.xlu0 %v67_v5, %s346_s0  ;;  %v71_v11 = vld [vmem:[#allocation2 + $0x28] sm:$0xff]  ;;  %v73_v12 = vld [vmem:[#allocation2 + $0x38] sm:$0xff]  ;;  %vm146_vm3 = vcmask 261248   ;;  %vm261_vm4 = vcmask 385280  }
  0x1a   :  { %49 = vst.msk [vmem:[#allocation5 + $0x41] sm:$0xff] %vm39_vm1, %v74_v7  ;;  %51 = vst.msk [vmem:[#allocation5 + $0x51] sm:$0xff] %vm39_vm1, %v76_v8  ;;  %v26_v13 = vld [vmem:[#allocation2 + $0x18] sm:$0x7f]  ;;  %v24_v14 = vld [vmem:[#allocation2 + $0x8] sm:$0x7f] }
  0x1b   :  { %53 = vst.msk [vmem:[#allocation5 + $0x61] sm:$0xff] %vm39_vm1, %v78_v9  ;;  %55 = vst.msk [vmem:[#allocation5 + $0x71] sm:$0xff] %vm39_vm1, %v80_v10  ;;  %v28_v15 = vld [vmem:[#allocation2 + $0x28] sm:$0x7f]  ;;  %v30_v16 = vld [vmem:[#allocation2 + $0x38] sm:$0x7f] }
  0x1c   :  { %44 = vst.msk [vmem:[#allocation5 + $0x19] sm:$0x7f] %vm41_vm2, %v26_v13  ;;  %42 = vst.msk [vmem:[#allocation5 + $0x9] sm:$0x7f] %vm41_vm2, %v24_v14  ;;  %v32_v17 = vld [vmem:[#allocation2 + $0x48] sm:$0x7f] }
  0x1d   :  { %108 = vrot.lane.b32.xlu1 %v71_v11, %s346_s0  ;;  %106 = vrot.lane.b32.xlu0 %v70_v3, %s346_s0  ;;  %46 = vst.msk [vmem:[#allocation5 + $0x29] sm:$0x7f] %vm41_vm2, %v28_v15  ;;  %48 = vst.msk [vmem:[#allocation5 + $0x39] sm:$0x7f] %vm41_vm2, %v30_v16  ;;  %v34_v18 = vld [vmem:[#allocation2 + $0x58] sm:$0x7f] }
  0x1e   :  { %v36_v19 = vld [vmem:[#allocation2 + $0x68] sm:$0x7f]  ;;  %50 = vst.msk [vmem:[#allocation5 + $0x49] sm:$0x7f] %vm41_vm2, %v32_v17  ;;  %52 = vst.msk [vmem:[#allocation5 + $0x59] sm:$0x7f] %vm41_vm2, %v34_v18 }
  0x1f   :  { %54 = vst.msk [vmem:[#allocation5 + $0x69] sm:$0x7f] %vm41_vm2, %v36_v19  ;;  %v75_v20 = vld [vmem:[#allocation2 + $0x48] sm:$0xff]  ;;  %v38_v21 = vld [vmem:[#allocation2 + $0x78] sm:$0x7f]  ;;  %vm245_vm5 = vcmask 391424  }
  0x20   :  { %56 = vst.msk [vmem:[#allocation5 + $0x79] sm:$0x7f] %vm41_vm2, %v38_v21  ;;  %v77_v22 = vld [vmem:[#allocation2 + $0x58] sm:$0xff]  ;;  %v79_v23 = vld [vmem:[#allocation2 + $0x68] sm:$0xff]  ;;  %vm243_vm6 = vcmask 392448   ;;  %s348_s21 = smov [#allocation5]  }
  0x21   :  { %112 = vrot.lane.b32.xlu1 %v73_v12, %s346_s0  ;;  %110 = vrot.lane.b32.xlu0 %v72_v6, %s346_s0  ;;  %v81_v24 = vld [vmem:[#allocation2 + $0x78] sm:$0xff]  ;;  %v164_v25 = vld [vmem:[#allocation2 + $0x9] sm:$0x7f]  ;;  %v163_v26 = vld [vmem:[#allocation2 + $0x1] sm:$0xff]  ;;  %s275_s22 = sshll.u32 %s348_s21, 4  ;;  %s276_s22 = int_to_ptr.vmem [resolvable:$true] %s275_s22 }
  0x22   :  { %v166_v27 = vld [vmem:[#allocation2 + $0x19] sm:$0x7f]  ;;  %v165_v28 = vld [vmem:[#allocation2 + $0x11] sm:$0xff]  ;;  %v168_v29 = vld [vmem:[#allocation2 + $0x29] sm:$0x7f]  ;;  %s316_s23 = scalar_lea.vmem %s276_s22, 2048  ;;  %p321_p9 = scmp.lt.s32.totalorder %s276_s22, %s276_s22 }
  0x23   :  { %v167_v30 = vld [vmem:[#allocation2 + $0x21] sm:$0xff]  ;;  %v170_v31 = vld [vmem:[#allocation2 + $0x39] sm:$0x7f]  ;;  %v169_v32 = vld [vmem:[#allocation2 + $0x31] sm:$0xff]  ;;  %p317_p8 = scmp.ne.s32.totalorder %s276_s22, %s316_s23  ;;  %p322_p10 = scmp.lt.s32.totalorder %s316_s23, %s316_s23 }
  0x24   :  { %v172_v33 = vld [vmem:[#allocation2 + $0x49] sm:$0x7f]  ;;  %v171_v34 = vld [vmem:[#allocation2 + $0x41] sm:$0xff]  ;;  %v174_v35 = vld [vmem:[#allocation2 + $0x59] sm:$0x7f] }
  0x25   :  { %116 = vrot.lane.b32.xlu1 %v75_v20, %s346_s0  ;;  %114 = vrot.lane.b32.xlu0 %v74_v7, %s346_s0  ;;  %v173_v36 = vld [vmem:[#allocation2 + $0x51] sm:$0xff]  ;;  %v176_v37 = vld [vmem:[#allocation2 + $0x69] sm:$0x7f]  ;;  %v175_v38 = vld [vmem:[#allocation2 + $0x61] sm:$0xff]  ;;  %p323_p11 = por %p322_p10, %p321_p9 }
  0x26   :  { %v178_v39 = vld [vmem:[#allocation2 + $0x79] sm:$0x7f]  ;;  %v177_v40 = vld [vmem:[#allocation2 + $0x71] sm:$0xff] }
  0x27   :  { %p324_p12 = pnand %p323_p11, %p317_p8 }
  0x29   :  { %120 = vrot.lane.b32.xlu1 %v77_v22, %s346_s0  ;;  %118 = vrot.lane.b32.xlu0 %v76_v8, %s346_s0 }
  0x2d   :  { %124 = vrot.lane.b32.xlu1 %v79_v23, %s346_s0  ;;  %122 = vrot.lane.b32.xlu0 %v78_v9, %s346_s0 }
  0x31   :  { %128 = vrot.lane.b32.xlu1 %v81_v24, %s346_s0  ;;  %126 = vrot.lane.b32.xlu0 %v80_v10, %s346_s0 }
  0x35   :  { %197 = vrot.lane.b32.xlu1 %v164_v25, %s347_s20  ;;  %195 = vrot.lane.b32.xlu0 %v163_v26, %s347_s20 }
  0x39   :  { %201 = vrot.lane.b32.xlu1 %v166_v27, %s347_s20  ;;  %199 = vrot.lane.b32.xlu0 %v165_v28, %s347_s20 }
  0x3d   :  { %205 = vrot.lane.b32.xlu1 %v168_v29, %s347_s20  ;;  %203 = vrot.lane.b32.xlu0 %v167_v30, %s347_s20 }
  0x41   :  { %209 = vrot.lane.b32.xlu1 %v170_v31, %s347_s20  ;;  %207 = vrot.lane.b32.xlu0 %v169_v32, %s347_s20 }
  0x45   :  { %213 = vrot.lane.b32.xlu1 %v172_v33, %s347_s20  ;;  %211 = vrot.lane.b32.xlu0 %v171_v34, %s347_s20 }
  0x49   :  { %217 = vrot.lane.b32.xlu1 %v174_v35, %s347_s20  ;;  %215 = vrot.lane.b32.xlu0 %v173_v36, %s347_s20 }
  0x4d   :  { %221 = vrot.lane.b32.xlu1 %v176_v37, %s347_s20  ;;  %219 = vrot.lane.b32.xlu0 %v175_v38, %s347_s20 }
  0x51   :  { %225 = vrot.lane.b32.xlu1 %v178_v39, %s347_s20  ;;  %223 = vrot.lane.b32.xlu0 %v177_v40, %s347_s20 }
  0x87   :  { %v103_v41 = vpop.permute.xlu1 %102  ;;  %v99_v42 = vpop.permute.xlu0 %98 }
  0x88   :  { %149 = vst.msk [vmem:[#allocation5 + $0x10] sm:$0xff] %vm146_vm3, %v103_v41  ;;  %147 = vst.msk [vmem:[#allocation5] sm:$0xff] %vm146_vm3, %v99_v42 }
  0x8b   :  { %v105_v43 = vpop.permute.xlu1 %104  ;;  %v101_v44 = vpop.permute.xlu0 %100 }
  0x8c   :  { %150 = vst.msk [vmem:[#allocation5 + $0x18] sm:$0xff] %vm146_vm3, %v105_v43  ;;  %148 = vst.msk [vmem:[#allocation5 + $0x8] sm:$0xff] %vm146_vm3, %v101_v44 }
  0x8d   :  { %263 = vst.msk [vmem:[#allocation5 + $0x1f] sm:$0x1] %vm261_vm4, %v345_v0  ;;  %262 = vst.msk [vmem:[#allocation5 + $0xf] sm:$0x1] %vm261_vm4, %v345_v0 }
  0x8f   :  { %v109_v45 = vpop.permute.xlu1 %108  ;;  %v107_v46 = vpop.permute.xlu0 %106 }
  0x90   :  { %152 = vst.msk [vmem:[#allocation5 + $0x28] sm:$0xff] %vm146_vm3, %v109_v45  ;;  %151 = vst.msk [vmem:[#allocation5 + $0x20] sm:$0xff] %vm146_vm3, %v107_v46 }
  0x91   :  { %264 = vst.msk [vmem:[#allocation5 + $0x2f] sm:$0x1] %vm261_vm4, %v345_v0 }
  0x93   :  { %v113_v47 = vpop.permute.xlu1 %112  ;;  %v111_v48 = vpop.permute.xlu0 %110 }
  0x94   :  { %154 = vst.msk [vmem:[#allocation5 + $0x38] sm:$0xff] %vm146_vm3, %v113_v47  ;;  %153 = vst.msk [vmem:[#allocation5 + $0x30] sm:$0xff] %vm146_vm3, %v111_v48 }
  0x95   :  { %265 = vst.msk [vmem:[#allocation5 + $0x3f] sm:$0x1] %vm261_vm4, %v345_v0 }
  0x97   :  { %v117_v49 = vpop.permute.xlu1 %116  ;;  %v115_v50 = vpop.permute.xlu0 %114 }
  0x98   :  { %156 = vst.msk [vmem:[#allocation5 + $0x48] sm:$0xff] %vm146_vm3, %v117_v49  ;;  %155 = vst.msk [vmem:[#allocation5 + $0x40] sm:$0xff] %vm146_vm3, %v115_v50 }
  0x99   :  { %266 = vst.msk [vmem:[#allocation5 + $0x4f] sm:$0x1] %vm261_vm4, %v345_v0 }
  0x9b   :  { %v121_v51 = vpop.permute.xlu1 %120  ;;  %v119_v52 = vpop.permute.xlu0 %118 }
  0x9c   :  { %158 = vst.msk [vmem:[#allocation5 + $0x58] sm:$0xff] %vm146_vm3, %v121_v51  ;;  %157 = vst.msk [vmem:[#allocation5 + $0x50] sm:$0xff] %vm146_vm3, %v119_v52 }
  0x9d   :  { %267 = vst.msk [vmem:[#allocation5 + $0x5f] sm:$0x1] %vm261_vm4, %v345_v0 }
  0x9f   :  { %v125_v53 = vpop.permute.xlu1 %124  ;;  %v123_v54 = vpop.permute.xlu0 %122 }
  0xa0   :  { %160 = vst.msk [vmem:[#allocation5 + $0x68] sm:$0xff] %vm146_vm3, %v125_v53  ;;  %159 = vst.msk [vmem:[#allocation5 + $0x60] sm:$0xff] %vm146_vm3, %v123_v54 }
  0xa1   :  { %268 = vst.msk [vmem:[#allocation5 + $0x6f] sm:$0x1] %vm261_vm4, %v345_v0 }
  0xa3   :  { %v129_v55 = vpop.permute.xlu1 %128  ;;  %v127_v56 = vpop.permute.xlu0 %126 }
  0xa4   :  { %162 = vst.msk [vmem:[#allocation5 + $0x78] sm:$0xff] %vm146_vm3, %v129_v55  ;;  %161 = vst.msk [vmem:[#allocation5 + $0x70] sm:$0xff] %vm146_vm3, %v127_v56 }
  0xa5   :  { %269 = vst.msk [vmem:[#allocation5 + $0x7f] sm:$0x1] %vm261_vm4, %v345_v0 }
  0xa7   :  { %v198_v57 = vpop.permute.xlu1 %197  ;;  %v196_v58 = vpop.permute.xlu0 %195 }
  0xa8   :  { %246 = vst.msk [vmem:[#allocation5 + $0x8] sm:$0x7f] %vm245_vm5, %v198_v57 }
  0xa9   :  { %244 = vst.msk [vmem:[#allocation5] sm:$0xff] %vm243_vm6, %v196_v58 }
  0xab   :  { %v202_v59 = vpop.permute.xlu1 %201  ;;  %v200_v60 = vpop.permute.xlu0 %199 }
  0xac   :  { %248 = vst.msk [vmem:[#allocation5 + $0x18] sm:$0x7f] %vm245_vm5, %v202_v59 }
  0xad   :  { %247 = vst.msk [vmem:[#allocation5 + $0x10] sm:$0xff] %vm243_vm6, %v200_v60 }
  0xaf   :  { %v206_v61 = vpop.permute.xlu1 %205  ;;  %v204_v62 = vpop.permute.xlu0 %203 }
  0xb0   :  { %250 = vst.msk [vmem:[#allocation5 + $0x28] sm:$0x7f] %vm245_vm5, %v206_v61 }
  0xb1   :  { %249 = vst.msk [vmem:[#allocation5 + $0x20] sm:$0xff] %vm243_vm6, %v204_v62 }
  0xb3   :  { %v210_v63 = vpop.permute.xlu1 %209  ;;  %v208_v0 = vpop.permute.xlu0 %207 }
  0xb4   :  { %252 = vst.msk [vmem:[#allocation5 + $0x38] sm:$0x7f] %vm245_vm5, %v210_v63 }
  0xb5   :  { %251 = vst.msk [vmem:[#allocation5 + $0x30] sm:$0xff] %vm243_vm6, %v208_v0 }
  0xb7   :  { %v214_v1 = vpop.permute.xlu1 %213  ;;  %v212_v2 = vpop.permute.xlu0 %211 }
  0xb8   :  { %254 = vst.msk [vmem:[#allocation5 + $0x48] sm:$0x7f] %vm245_vm5, %v214_v1 }
  0xb9   :  { %253 = vst.msk [vmem:[#allocation5 + $0x40] sm:$0xff] %vm243_vm6, %v212_v2 }
  0xbb   :  { %v218_v3 = vpop.permute.xlu1 %217  ;;  %v216_v4 = vpop.permute.xlu0 %215 }
  0xbc   :  { %256 = vst.msk [vmem:[#allocation5 + $0x58] sm:$0x7f] %vm245_vm5, %v218_v3 }
  0xbd   :  { %255 = vst.msk [vmem:[#allocation5 + $0x50] sm:$0xff] %vm243_vm6, %v216_v4 }
  0xbf   :  { %v222_v5 = vpop.permute.xlu1 %221  ;;  %v220_v6 = vpop.permute.xlu0 %219 }
  0xc0   :  { %258 = vst.msk [vmem:[#allocation5 + $0x68] sm:$0x7f] %vm245_vm5, %v222_v5 }
  0xc1   :  { %257 = vst.msk [vmem:[#allocation5 + $0x60] sm:$0xff] %vm243_vm6, %v220_v6 }
  0xc3   :  { %v226_v7 = vpop.permute.xlu1 %225  ;;  %v224_v8 = vpop.permute.xlu0 %223 }
  0xc4   :  { %260 = vst.msk [vmem:[#allocation5 + $0x78] sm:$0x7f] %vm245_vm5, %v226_v7 }
  0xc5   :  { %259 = vst.msk [vmem:[#allocation5 + $0x70] sm:$0xff] %vm243_vm6, %v224_v8 }
  0xc6   :  { %327 = shalt.err (!%p324_p12)
}
  0xc7   :  { %s328_s26 = scalar_lea.hbm %s478_s1, 2048 }
  0xc8   :  { %p329_p13 = scmp.ne.s32.totalorder %s478_s1, %s328_s26  ;;  %p332_p0 = scmp.lt.u32.totalorder %s328_s26, %s478_s1 }
  0xca   :  { %p334_p1 = pnand %p332_p0, %p329_p13 }
  0xcc   :  { %337 = shalt.err (!%p334_p1)
}
  0xcd   :  { %281 = dma.vmem_to_hbm [thread:$0]  %s276_s22, 2048, %s478_s1, [#allocation4], %s343_s16, %s343_s16, %s344_s17  }
  0xce   :  { %340 = dma.done.wait [#allocation4], 2048  }
  0xcf   :  { %341 = vsyncadd [#allocation4], 4294965248 }
  0xd0   :  { %285 = vsyncpa [#allocation3], 1 }
  0xd1   :  { %286 = vsyncpa [#allocation4], 1 }

</bundles_post_ra>
